<compile_context>
chip_gen: v7x
topology: tpu7x:2x2x1
jax: 0.10.0
libtpu: 0.0.40
codegen_flags: <defaults>
</compile_context>

<pallas_src>
import jax
import jax.numpy as jnp
from jax import lax
from jax.experimental import pallas as pl
from jax.experimental.pallas import tpu as pltpu


# ----------------------------- Pallas kernels ------------------------------- #

def _build_unfolded(x_ref, xu_ref):
    """xu[q, j*Cin:(j+1)*Cin] = x[q-j] (zero outside [0, L_in)), q in [0, L_in+2)."""
    l_in, cin = x_ref.shape
    x = x_ref[...]
    xu_ref[...] = jnp.zeros(xu_ref.shape, xu_ref.dtype)
    xu_ref[0:l_in, 0:cin] = x                       # j = 0
    xu_ref[1:l_in + 1, cin:2 * cin] = x             # j = 1
    xu_ref[2:l_in + 2, 2 * cin:3 * cin] = x         # j = 2


def _tconv_bn_relu_kernel(x_ref, w_ref, scale_ref, shift_ref, o_ref, xu_ref):
    """Fused polyphase ConvTranspose1d + BatchNorm(eval) + ReLU (one batch element).

    x_ref     : (L_in, Cin)            activation (channels-last)
    w_ref     : (3*Cin, s*Cout)        tap-packed transposed-conv weight
    scale_ref : (1, s*Cout)            BN scale, tiled per phase
    shift_ref : (1, s*Cout)            BN shift (conv bias folded), tiled per phase
    o_ref     : (L_in+2, s*Cout)       phase-packed output
    xu_ref    : VMEM scratch (L_in+2, 3*Cin)
    """
    _build_unfolded(x_ref, xu_ref)
    y = lax.dot_general(xu_ref[...], w_ref[...],
                        dimension_numbers=(((1,), (0,)), ((), ())),
                        preferred_element_type=jnp.float32)
    y = y * scale_ref[...] + shift_ref[...]
    o_ref[...] = jnp.maximum(y, 0.0).astype(o_ref.dtype)


def _tconv_relu_conv1x1_kernel(x_ref, w_ref, b3_ref, w4_ref, b4_ref, o_ref, xu_ref):
    """Fused polyphase ConvTranspose1d + bias + ReLU + 1x1 Conv1d + bias."""
    _build_unfolded(x_ref, xu_ref)
    h = lax.dot_general(xu_ref[...], w_ref[...],
                        dimension_numbers=(((1,), (0,)), ((), ())),
                        preferred_element_type=jnp.float32)
    h = jnp.maximum(h + b3_ref[...], 0.0)
    out = lax.dot_general(h, w4_ref[...],
                          dimension_numbers=(((1,), (0,)), ((), ())),
                          preferred_element_type=jnp.float32) + b4_ref[...]
    o_ref[...] = out.astype(o_ref.dtype)


# ------------------------------ JAX glue ------------------------------------ #

def _pack_tconv_weight(w, stride):
    """(Cin, Cout, k) PyTorch tconv weight -> (3*Cin, stride*Cout) packed weight.

    W_big[j*Cin+ci, p*Cout+co] = w[ci, co, j*stride + p]  (0 if tap >= k).
    Valid because k = 2*stride + 1 for every layer of this decoder.
    """
    cin, cout, k = w.shape
    assert k == 2 * stride + 1
    w_p = jnp.pad(w, ((0, 0), (0, 0), (0, 3 * stride - k)))     # pad taps to 3*stride
    w_jp = w_p.reshape(cin, cout, 3, stride)                    # [ci, co, j, p]
    return jnp.transpose(w_jp, (2, 0, 3, 1)).reshape(3 * cin, stride * cout)


def tconv_bn_relu(x_nlc, w, b, gamma, beta, rmean, rvar, stride, output_padding,
                  eps=1e-5):
    """ConvTranspose1d -> BatchNorm1d(eval) -> ReLU, channels-last (NLC)."""
    n, l_in, cin = x_nlc.shape
    _, cout, k = w.shape
    assert k == 2 * stride + 1 and output_padding == stride - 1
    l_q = l_in + 2                                     # output positions per phase
    w_big = _pack_tconv_weight(w, stride)
    scale = gamma / jnp.sqrt(rvar + eps)
    shift = beta + scale * (b - rmean)                 # conv bias folded into BN
    scale_p = jnp.tile(scale, stride)[None, :]
    shift_p = jnp.tile(shift, stride)[None, :]

    y = pl.pallas_call(
        _tconv_bn_relu_kernel,
        out_shape=jax.ShapeDtypeStruct((n, l_q, stride * cout), x_nlc.dtype),
        grid=(n,),
        in_specs=[
            pl.BlockSpec((None, l_in, cin), lambda bi: (bi, 0, 0)),
            pl.BlockSpec((3 * cin, stride * cout), lambda bi: (0, 0)),
            pl.BlockSpec((1, stride * cout), lambda bi: (0, 0)),
            pl.BlockSpec((1, stride * cout), lambda bi: (0, 0)),
        ],
        out_specs=pl.BlockSpec((None, l_q, stride * cout), lambda bi: (bi, 0, 0)),
        scratch_shapes=[pltpu.VMEM((l_q, 3 * cin), jnp.float32)],
        compiler_params=pltpu.CompilerParams(dimension_semantics=("parallel",)),
    )(x_nlc, w_big, scale_p, shift_p)
    # Interleave the `stride` phases: (n, l_q, s*cout) and (n, l_q*s, cout) share
    # the same row-major layout, so this reshape is free (no data movement).
    return y.reshape(n, l_q * stride, cout)


def tconv_relu_conv1x1(x_nlc, w3, b3, w4, b4, stride, output_padding):
    """ConvTranspose1d -> ReLU -> Conv1d(kernel=1), channels-last (NLC)."""
    n, l_in, cin = x_nlc.shape
    _, cmid, k = w3.shape
    cfin = w4.shape[0]                                 # PyTorch conv weight (Cfin, Cmid, 1)
    assert k == 2 * stride + 1 and output_padding == stride - 1
    l_q = l_in + 2
    w_big = _pack_tconv_weight(w3, stride)
    b3_p = jnp.tile(b3, stride)[None, :]
    # Block-diagonal 1x1-conv weight so the second matmul stays phase-packed.
    w4_big = jnp.kron(jnp.eye(stride, dtype=w4.dtype), w4[:, :, 0].T)  # (s*Cmid, s*Cfin)
    b4_p = jnp.tile(b4, stride)[None, :]

    y = pl.pallas_call(
        _tconv_relu_conv1x1_kernel,
        out_shape=jax.ShapeDtypeStruct((n, l_q, stride * cfin), x_nlc.dtype),
        grid=(n,),
        in_specs=[
            pl.BlockSpec((None, l_in, cin), lambda bi: (bi, 0, 0)),
            pl.BlockSpec((3 * cin, stride * cmid), lambda bi: (0, 0)),
            pl.BlockSpec((1, stride * cmid), lambda bi: (0, 0)),
            pl.BlockSpec((stride * cmid, stride * cfin), lambda bi: (0, 0)),
            pl.BlockSpec((1, stride * cfin), lambda bi: (0, 0)),
        ],
        out_specs=pl.BlockSpec((None, l_q, stride * cfin), lambda bi: (bi, 0, 0)),
        scratch_shapes=[pltpu.VMEM((l_q, 3 * cin), jnp.float32)],
        compiler_params=pltpu.CompilerParams(dimension_semantics=("parallel",)),
    )(x_nlc, w_big, b3_p, w4_big, b4_p)
    return y.reshape(n, l_q * stride, cfin)


# --------------------------- Decoder forward -------------------------------- #

def init_decoder_params(key, in_channels, out_channels):
    """Deterministic synthetic parameters with PyTorch-like shapes."""
    ks = jax.random.split(key, 16)
    c1, c2, c3 = in_channels, in_channels * 2, in_channels * 4
    cmid, cfin = out_channels * 2, out_channels

    def uni(k, shape, fan):
        bound = 1.0 / jnp.sqrt(jnp.float32(fan))
        return jax.random.uniform(k, shape, jnp.float32, -bound, bound)

    p = {}
    # tconv1: ConvTranspose1d(c1 -> c2, k=5, s=2, op=1)
    p["w1"] = uni(ks[0], (c1, c2, 5), c1 * 5)
    p["b1"] = uni(ks[1], (c2,), c1 * 5)
    p["g1"] = 1.0 + 0.1 * jax.random.normal(ks[2], (c2,), jnp.float32)
    p["be1"] = 0.1 * jax.random.normal(ks[3], (c2,), jnp.float32)
    p["rm1"] = jnp.zeros((c2,), jnp.float32)
    p["rv1"] = jnp.ones((c2,), jnp.float32)
    # tconv2: ConvTranspose1d(c2 -> c3, k=7, s=3, op=2)
    p["w2"] = uni(ks[4], (c2, c3, 7), c2 * 7)
    p["b2"] = uni(ks[5], (c3,), c2 * 7)
    p["g2"] = 1.0 + 0.1 * jax.random.normal(ks[6], (c3,), jnp.float32)
    p["be2"] = 0.1 * jax.random.normal(ks[7], (c3,), jnp.float32)
    p["rm2"] = jnp.zeros((c3,), jnp.float32)
    p["rv2"] = jnp.ones((c3,), jnp.float32)
    # tconv3: ConvTranspose1d(c3 -> cmid, k=9, s=4, op=3), then Conv1d(cmid -> cfin, k=1)
    p["w3"] = uni(ks[8], (c3, cmid, 9), c3 * 9)
    p["b3"] = uni(ks[9], (cmid,), c3 * 9)
    p["w4"] = uni(ks[10], (cfin, cmid, 1), cmid)
    p["b4"] = uni(ks[11], (cfin,), cmid)
    return p


@jax.jit
def decoder_forward(params, x_ncl):
    """x_ncl: (N, C_in, L) -> (N, C_out, 24*L + 80), matching the PyTorch module."""
    x = jnp.transpose(x_ncl, (0, 2, 1))  # NCL -> NLC (channels on lanes)
    x = tconv_bn_relu(x, params["w1"], params["b1"], params["g1"], params["be1"],
                      params["rm1"], params["rv1"], stride=2, output_padding=1)
    x = tconv_bn_relu(x, params["w2"], params["b2"], params["g2"], params["be2"],
                      params["rm2"], params["rv2"], stride=3, output_padding=2)
    x = tconv_relu_conv1x1(x, params["w3"], params["b3"], params["w4"],
                           params["b4"], stride=4, output_padding=3)
    return jnp.transpose(x, (0, 2, 1))   # back to NCL like PyTorch


# --------------------------- pure-JAX reference ------------------------------ #

def _ref_tconv(x_nlc, w, stride, output_padding):
    """Scatter-add formulation of ConvTranspose1d (no bias), NLC layout."""
    n, l, _ = x_nlc.shape
    _, c_out, k = w.shape
    l_out = (l - 1) * stride + k + output_padding
    y = jnp.zeros((n, l_out, c_out), jnp.float32)
    contrib = jnp.einsum("nlc,cok->nlok", x_nlc, w)     # (n, l, cout, k)
    for j in range(l):
        y = y.at[:, j * stride:j * stride + k, :].add(
            contrib[:, j].transpose(0, 2, 1))
    return y


def decoder_reference(params, x_ncl, eps=1e-5):
    x = jnp.transpose(x_ncl, (0, 2, 1))
    z = _ref_tconv(x, params["w1"], 2, 1) + params["b1"]
    z = (z - params["rm1"]) / jnp.sqrt(params["rv1"] + eps) * params["g1"] + params["be1"]
    x = jnp.maximum(z, 0.0)
    z = _ref_tconv(x, params["w2"], 3, 2) + params["b2"]
    z = (z - params["rm2"]) / jnp.sqrt(params["rv2"] + eps) * params["g2"] + params["be2"]
    x = jnp.maximum(z, 0.0)
    z = _ref_tconv(x, params["w3"], 4, 3) + params["b3"]
    h = jnp.maximum(z, 0.0)
    out = jnp.einsum("nlc,cf->nlf", h, params["w4"][:, :, 0].T) + params["b4"]
    return jnp.transpose(out, (0, 2, 1))


# --------------------------------- main -------------------------------------- #

if __name__ == "__main__":
    N, C_IN, C_OUT, L = 2, 4, 4, 8
    key = jax.random.PRNGKey(0)
    k_p, k_x = jax.random.split(key)
    params = init_decoder_params(k_p, C_IN, C_OUT)
    x = jax.random.normal(k_x, (N, C_IN, L), jnp.float32)   # NCL, like PyTorch

    out = jax.block_until_ready(decoder_forward(params, x))

    # L1 = 2L+4, L2 = 3*L1+6, L3 = 4*L2+8 = 24L+80  (for L=8 -> 272)
    assert out.shape == (N, C_OUT, 24 * L + 80), out.shape
    ref = decoder_reference(params, x)
    assert jnp.allclose(out, ref, rtol=1e-4, atol=1e-4), float(
        jnp.max(jnp.abs(out - ref)))

    print("KERNEL_OK")
</pallas_src>

<mosaic_0001>
module attributes {stable_mosaic.version = 11 : i64} {
  func.func @_tconv_bn_relu_kernel(%arg0: i32, %arg1: memref<1x8x4xf32, #tpu.memory_space<vmem>>, %arg2: memref<12x16xf32, #tpu.memory_space<vmem>>, %arg3: memref<1x16xf32, #tpu.memory_space<vmem>>, %arg4: memref<1x16xf32, #tpu.memory_space<vmem>>, %arg5: memref<1x10x16xf32, #tpu.memory_space<vmem>>, %arg6: memref<10x12xf32, #tpu.memory_space<vmem>>) attributes {dimension_semantics = [#tpu.dimension_semantics<parallel>], iteration_bounds = array<i64: 2>, scalar_prefetch = 0 : i64, scratch_operands = 1 : i64, tpu.core_type = #tpu.core_type<tc>, window_params = [{transform_indices = @transform_0, window_bounds = array<i64: 1, 8, 4>}, {pipeline_mode = #tpu.pipeline_mode<synchronous>, transform_indices = @transform_1, window_bounds = array<i64: 12, 16>}, {pipeline_mode = #tpu.pipeline_mode<synchronous>, transform_indices = @transform_2, window_bounds = array<i64: 1, 16>}, {pipeline_mode = #tpu.pipeline_mode<synchronous>, transform_indices = @transform_3, window_bounds = array<i64: 1, 16>}, {transform_indices = @transform_4, window_bounds = array<i64: 1, 10, 16>}]} {
    %c0 = arith.constant 0 : index
    %c0_0 = arith.constant 0 : index
    %c0_1 = arith.constant 0 : index
    %0 = vector.load %arg1[%c0, %c0_0, %c0_1] : memref<1x8x4xf32, #tpu.memory_space<vmem>>, vector<1x8x4xf32>
    %1 = vector.shape_cast %0 : vector<1x8x4xf32> to vector<8x4xf32>
    %cst = arith.constant 0.000000e+00 : f32
    %2 = vector.broadcast %cst : f32 to vector<10x12xf32>
    %c0_2 = arith.constant 0 : index
    %c0_3 = arith.constant 0 : index
    %3 = vector.load %arg6[%c0_2, %c0_3] : memref<10x12xf32, #tpu.memory_space<vmem>>, vector<10x12xf32>
    tpu.vector_store %arg6[%c0_2, %c0_3], %2 {strides = array<i32>} : memref<10x12xf32, #tpu.memory_space<vmem>>, vector<10x12xf32>,
    %c0_4 = arith.constant 0 : index
    %c0_5 = arith.constant 0 : index
    %4 = vector.load %arg6[%c0_4, %c0_5] : memref<10x12xf32, #tpu.memory_space<vmem>>, vector<8x4xf32>
    tpu.vector_store %arg6[%c0_4, %c0_5], %1 {strides = array<i32>} : memref<10x12xf32, #tpu.memory_space<vmem>>, vector<8x4xf32>,
    %c1 = arith.constant 1 : index
    %c4 = arith.constant 4 : index
    %5 = vector.load %arg6[%c1, %c4] : memref<10x12xf32, #tpu.memory_space<vmem>>, vector<8x4xf32>
    tpu.vector_store %arg6[%c1, %c4], %1 {strides = array<i32>} : memref<10x12xf32, #tpu.memory_space<vmem>>, vector<8x4xf32>,
    %c2 = arith.constant 2 : index
    %c8 = arith.constant 8 : index
    %6 = vector.load %arg6[%c2, %c8] : memref<10x12xf32, #tpu.memory_space<vmem>>, vector<8x4xf32>
    tpu.vector_store %arg6[%c2, %c8], %1 {strides = array<i32>} : memref<10x12xf32, #tpu.memory_space<vmem>>, vector<8x4xf32>,
    %c0_6 = arith.constant 0 : index
    %c0_7 = arith.constant 0 : index
    %7 = vector.load %arg6[%c0_6, %c0_7] : memref<10x12xf32, #tpu.memory_space<vmem>>, vector<10x12xf32>
    %c0_8 = arith.constant 0 : index
    %c0_9 = arith.constant 0 : index
    %8 = vector.load %arg2[%c0_8, %c0_9] : memref<12x16xf32, #tpu.memory_space<vmem>>, vector<12x16xf32>
    %cst_10 = arith.constant dense<0.000000e+00> : vector<10x16xf32>
    %9 = tpu.matmul %7, %8, %cst_10 {dimension_numbers = #tpu.dot_dimension_numbers<[1], [0], [0], [1], [0, 0, 1, 1], [], []>} : vector<10x12xf32>, vector<12x16xf32>, vector<10x16xf32> -> vector<10x16xf32>
    %c0_11 = arith.constant 0 : index
    %c0_12 = arith.constant 0 : index
    %10 = vector.load %arg3[%c0_11, %c0_12] : memref<1x16xf32, #tpu.memory_space<vmem>>, vector<1x16xf32>
    %11 = vector.broadcast %10 : vector<1x16xf32> to vector<10x16xf32>
    %12 = arith.mulf %9, %11 : vector<10x16xf32>
    %c0_13 = arith.constant 0 : index
    %c0_14 = arith.constant 0 : index
    %13 = vector.load %arg4[%c0_13, %c0_14] : memref<1x16xf32, #tpu.memory_space<vmem>>, vector<1x16xf32>
    %14 = vector.broadcast %13 : vector<1x16xf32> to vector<10x16xf32>
    %15 = arith.addf %12, %14 : vector<10x16xf32>
    %cst_15 = arith.constant 0.000000e+00 : f32
    %16 = vector.broadcast %cst_15 : f32 to vector<10x16xf32>
    %17 = arith.maximumf %15, %16 : vector<10x16xf32>
    %c0_16 = arith.constant 0 : index
    %c0_17 = arith.constant 0 : index
    %c0_18 = arith.constant 0 : index
    %18 = vector.load %arg5[%c0_16, %c0_17, %c0_18] : memref<1x10x16xf32, #tpu.memory_space<vmem>>, vector<1x10x16xf32>
    %19 = vector.shape_cast %18 : vector<1x10x16xf32> to vector<10x16xf32>
    %20 = vector.shape_cast %17 : vector<10x16xf32> to vector<1x10x16xf32>
    tpu.vector_store %arg5[%c0_16, %c0_17, %c0_18], %20 {strides = array<i32>} : memref<1x10x16xf32, #tpu.memory_space<vmem>>, vector<1x10x16xf32>,
    return
  }
  func.func @transform_0(%arg0: i32) -> (i32, i32, i32) {
    %c0_i32 = arith.constant 0 : i32
    %c0_i32_0 = arith.constant 0 : i32
    %c0_i32_1 = arith.constant 0 : i32
    return %arg0, %c0_i32, %c0_i32_0 : i32, i32, i32
  }
  func.func @transform_1(%arg0: i32) -> (i32, i32) {
    %c0_i32 = arith.constant 0 : i32
    %c0_i32_0 = arith.constant 0 : i32
    %c0_i32_1 = arith.constant 0 : i32
    return %c0_i32, %c0_i32_0 : i32, i32
  }
  func.func @transform_2(%arg0: i32) -> (i32, i32) {
    %c0_i32 = arith.constant 0 : i32
    %c0_i32_0 = arith.constant 0 : i32
    %c0_i32_1 = arith.constant 0 : i32
    return %c0_i32, %c0_i32_0 : i32, i32
  }
  func.func @transform_3(%arg0: i32) -> (i32, i32) {
    %c0_i32 = arith.constant 0 : i32
    %c0_i32_0 = arith.constant 0 : i32
    %c0_i32_1 = arith.constant 0 : i32
    return %c0_i32, %c0_i32_0 : i32, i32
  }
  func.func @transform_4(%arg0: i32) -> (i32, i32, i32) {
    %c0_i32 = arith.constant 0 : i32
    %c0_i32_0 = arith.constant 0 : i32
    %c0_i32_1 = arith.constant 0 : i32
    return %arg0, %c0_i32, %c0_i32_0 : i32, i32, i32
  }
}

module attributes {stable_mosaic.version = 11 : i64} {
  func.func @_tconv_bn_relu_kernel(%arg0: i32, %arg1: memref<1x20x8xf32, #tpu.memory_space<vmem>>, %arg2: memref<24x48xf32, #tpu.memory_space<vmem>>, %arg3: memref<1x48xf32, #tpu.memory_space<vmem>>, %arg4: memref<1x48xf32, #tpu.memory_space<vmem>>, %arg5: memref<1x22x48xf32, #tpu.memory_space<vmem>>, %arg6: memref<22x24xf32, #tpu.memory_space<vmem>>) attributes {dimension_semantics = [#tpu.dimension_semantics<parallel>], iteration_bounds = array<i64: 2>, scalar_prefetch = 0 : i64, scratch_operands = 1 : i64, tpu.core_type = #tpu.core_type<tc>, window_params = [{transform_indices = @transform_0, window_bounds = array<i64: 1, 20, 8>}, {pipeline_mode = #tpu.pipeline_mode<synchronous>, transform_indices = @transform_1, window_bounds = array<i64: 24, 48>}, {pipeline_mode = #tpu.pipeline_mode<synchronous>, transform_indices = @transform_2, window_bounds = array<i64: 1, 48>}, {pipeline_mode = #tpu.pipeline_mode<synchronous>, transform_indices = @transform_3, window_bounds = array<i64: 1, 48>}, {transform_indices = @transform_4, window_bounds = array<i64: 1, 22, 48>}]} {
    %c0 = arith.constant 0 : index
    %c0_0 = arith.constant 0 : index
    %c0_1 = arith.constant 0 : index
    %0 = vector.load %arg1[%c0, %c0_0, %c0_1] : memref<1x20x8xf32, #tpu.memory_space<vmem>>, vector<1x20x8xf32>
    %1 = vector.shape_cast %0 : vector<1x20x8xf32> to vector<20x8xf32>
    %cst = arith.constant 0.000000e+00 : f32
    %2 = vector.broadcast %cst : f32 to vector<22x24xf32>
    %c0_2 = arith.constant 0 : index
    %c0_3 = arith.constant 0 : index
    %3 = vector.load %arg6[%c0_2, %c0_3] : memref<22x24xf32, #tpu.memory_space<vmem>>, vector<22x24xf32>
    tpu.vector_store %arg6[%c0_2, %c0_3], %2 {strides = array<i32>} : memref<22x24xf32, #tpu.memory_space<vmem>>, vector<22x24xf32>,
    %c0_4 = arith.constant 0 : index
    %c0_5 = arith.constant 0 : index
    %4 = vector.load %arg6[%c0_4, %c0_5] : memref<22x24xf32, #tpu.memory_space<vmem>>, vector<20x8xf32>
    tpu.vector_store %arg6[%c0_4, %c0_5], %1 {strides = array<i32>} : memref<22x24xf32, #tpu.memory_space<vmem>>, vector<20x8xf32>,
    %c1 = arith.constant 1 : index
    %c8 = arith.constant 8 : index
    %5 = vector.load %arg6[%c1, %c8] : memref<22x24xf32, #tpu.memory_space<vmem>>, vector<20x8xf32>
    tpu.vector_store %arg6[%c1, %c8], %1 {strides = array<i32>} : memref<22x24xf32, #tpu.memory_space<vmem>>, vector<20x8xf32>,
    %c2 = arith.constant 2 : index
    %c16 = arith.constant 16 : index
    %6 = vector.load %arg6[%c2, %c16] : memref<22x24xf32, #tpu.memory_space<vmem>>, vector<20x8xf32>
    tpu.vector_store %arg6[%c2, %c16], %1 {strides = array<i32>} : memref<22x24xf32, #tpu.memory_space<vmem>>, vector<20x8xf32>,
    %c0_6 = arith.constant 0 : index
    %c0_7 = arith.constant 0 : index
    %7 = vector.load %arg6[%c0_6, %c0_7] : memref<22x24xf32, #tpu.memory_space<vmem>>, vector<22x24xf32>
    %c0_8 = arith.constant 0 : index
    %c0_9 = arith.constant 0 : index
    %8 = vector.load %arg2[%c0_8, %c0_9] : memref<24x48xf32, #tpu.memory_space<vmem>>, vector<24x48xf32>
    %cst_10 = arith.constant dense<0.000000e+00> : vector<22x48xf32>
    %9 = tpu.matmul %7, %8, %cst_10 {dimension_numbers = #tpu.dot_dimension_numbers<[1], [0], [0], [1], [0, 0, 1, 1], [], []>} : vector<22x24xf32>, vector<24x48xf32>, vector<22x48xf32> -> vector<22x48xf32>
    %c0_11 = arith.constant 0 : index
    %c0_12 = arith.constant 0 : index
    %10 = vector.load %arg3[%c0_11, %c0_12] : memref<1x48xf32, #tpu.memory_space<vmem>>, vector<1x48xf32>
    %11 = vector.broadcast %10 : vector<1x48xf32> to vector<22x48xf32>
    %12 = arith.mulf %9, %11 : vector<22x48xf32>
    %c0_13 = arith.constant 0 : index
    %c0_14 = arith.constant 0 : index
    %13 = vector.load %arg4[%c0_13, %c0_14] : memref<1x48xf32, #tpu.memory_space<vmem>>, vector<1x48xf32>
    %14 = vector.broadcast %13 : vector<1x48xf32> to vector<22x48xf32>
    %15 = arith.addf %12, %14 : vector<22x48xf32>
    %cst_15 = arith.constant 0.000000e+00 : f32
    %16 = vector.broadcast %cst_15 : f32 to vector<22x48xf32>
    %17 = arith.maximumf %15, %16 : vector<22x48xf32>
    %c0_16 = arith.constant 0 : index
    %c0_17 = arith.constant 0 : index
    %c0_18 = arith.constant 0 : index
    %18 = vector.load %arg5[%c0_16, %c0_17, %c0_18] : memref<1x22x48xf32, #tpu.memory_space<vmem>>, vector<1x22x48xf32>
    %19 = vector.shape_cast %18 : vector<1x22x48xf32> to vector<22x48xf32>
    %20 = vector.shape_cast %17 : vector<22x48xf32> to vector<1x22x48xf32>
    tpu.vector_store %arg5[%c0_16, %c0_17, %c0_18], %20 {strides = array<i32>} : memref<1x22x48xf32, #tpu.memory_space<vmem>>, vector<1x22x48xf32>,
    return
  }
  func.func @transform_0(%arg0: i32) -> (i32, i32, i32) {
    %c0_i32 = arith.constant 0 : i32
    %c0_i32_0 = arith.constant 0 : i32
    %c0_i32_1 = arith.constant 0 : i32
    return %arg0, %c0_i32, %c0_i32_0 : i32, i32, i32
  }
  func.func @transform_1(%arg0: i32) -> (i32, i32) {
    %c0_i32 = arith.constant 0 : i32
    %c0_i32_0 = arith.constant 0 : i32
    %c0_i32_1 = arith.constant 0 : i32
    return %c0_i32, %c0_i32_0 : i32, i32
  }
  func.func @transform_2(%arg0: i32) -> (i32, i32) {
    %c0_i32 = arith.constant 0 : i32
    %c0_i32_0 = arith.constant 0 : i32
    %c0_i32_1 = arith.constant 0 : i32
    return %c0_i32, %c0_i32_0 : i32, i32
  }
  func.func @transform_3(%arg0: i32) -> (i32, i32) {
    %c0_i32 = arith.constant 0 : i32
    %c0_i32_0 = arith.constant 0 : i32
    %c0_i32_1 = arith.constant 0 : i32
    return %c0_i32, %c0_i32_0 : i32, i32
  }
  func.func @transform_4(%arg0: i32) -> (i32, i32, i32) {
    %c0_i32 = arith.constant 0 : i32
    %c0_i32_0 = arith.constant 0 : i32
    %c0_i32_1 = arith.constant 0 : i32
    return %arg0, %c0_i32, %c0_i32_0 : i32, i32, i32
  }
}

module attributes {stable_mosaic.version = 11 : i64} {
  func.func @_tconv_relu_conv1x1_kernel(%arg0: i32, %arg1: memref<1x66x16xf32, #tpu.memory_space<vmem>>, %arg2: memref<48x32xf32, #tpu.memory_space<vmem>>, %arg3: memref<1x32xf32, #tpu.memory_space<vmem>>, %arg4: memref<32x16xf32, #tpu.memory_space<vmem>>, %arg5: memref<1x16xf32, #tpu.memory_space<vmem>>, %arg6: memref<1x68x16xf32, #tpu.memory_space<vmem>>, %arg7: memref<68x48xf32, #tpu.memory_space<vmem>>) attributes {dimension_semantics = [#tpu.dimension_semantics<parallel>], iteration_bounds = array<i64: 2>, scalar_prefetch = 0 : i64, scratch_operands = 1 : i64, tpu.core_type = #tpu.core_type<tc>, window_params = [{transform_indices = @transform_0, window_bounds = array<i64: 1, 66, 16>}, {pipeline_mode = #tpu.pipeline_mode<synchronous>, transform_indices = @transform_1, window_bounds = array<i64: 48, 32>}, {pipeline_mode = #tpu.pipeline_mode<synchronous>, transform_indices = @transform_2, window_bounds = array<i64: 1, 32>}, {pipeline_mode = #tpu.pipeline_mode<synchronous>, transform_indices = @transform_3, window_bounds = array<i64: 32, 16>}, {pipeline_mode = #tpu.pipeline_mode<synchronous>, transform_indices = @transform_4, window_bounds = array<i64: 1, 16>}, {transform_indices = @transform_5, window_bounds = array<i64: 1, 68, 16>}]} {
    %c0 = arith.constant 0 : index
    %c0_0 = arith.constant 0 : index
    %c0_1 = arith.constant 0 : index
    %0 = vector.load %arg1[%c0, %c0_0, %c0_1] : memref<1x66x16xf32, #tpu.memory_space<vmem>>, vector<1x66x16xf32>
    %1 = vector.shape_cast %0 : vector<1x66x16xf32> to vector<66x16xf32>
    %cst = arith.constant 0.000000e+00 : f32
    %2 = vector.broadcast %cst : f32 to vector<68x48xf32>
    %c0_2 = arith.constant 0 : index
    %c0_3 = arith.constant 0 : index
    %3 = vector.load %arg7[%c0_2, %c0_3] : memref<68x48xf32, #tpu.memory_space<vmem>>, vector<68x48xf32>
    tpu.vector_store %arg7[%c0_2, %c0_3], %2 {strides = array<i32>} : memref<68x48xf32, #tpu.memory_space<vmem>>, vector<68x48xf32>,
    %c0_4 = arith.constant 0 : index
    %c0_5 = arith.constant 0 : index
    %4 = vector.load %arg7[%c0_4, %c0_5] : memref<68x48xf32, #tpu.memory_space<vmem>>, vector<66x16xf32>
    tpu.vector_store %arg7[%c0_4, %c0_5], %1 {strides = array<i32>} : memref<68x48xf32, #tpu.memory_space<vmem>>, vector<66x16xf32>,
    %c1 = arith.constant 1 : index
    %c16 = arith.constant 16 : index
    %5 = vector.load %arg7[%c1, %c16] : memref<68x48xf32, #tpu.memory_space<vmem>>, vector<66x16xf32>
    tpu.vector_store %arg7[%c1, %c16], %1 {strides = array<i32>} : memref<68x48xf32, #tpu.memory_space<vmem>>, vector<66x16xf32>,
    %c2 = arith.constant 2 : index
    %c32 = arith.constant 32 : index
    %6 = vector.load %arg7[%c2, %c32] : memref<68x48xf32, #tpu.memory_space<vmem>>, vector<66x16xf32>
    tpu.vector_store %arg7[%c2, %c32], %1 {strides = array<i32>} : memref<68x48xf32, #tpu.memory_space<vmem>>, vector<66x16xf32>,
    %c0_6 = arith.constant 0 : index
    %c0_7 = arith.constant 0 : index
    %7 = vector.load %arg7[%c0_6, %c0_7] : memref<68x48xf32, #tpu.memory_space<vmem>>, vector<68x48xf32>
    %c0_8 = arith.constant 0 : index
    %c0_9 = arith.constant 0 : index
    %8 = vector.load %arg2[%c0_8, %c0_9] : memref<48x32xf32, #tpu.memory_space<vmem>>, vector<48x32xf32>
    %cst_10 = arith.constant dense<0.000000e+00> : vector<68x32xf32>
    %9 = tpu.matmul %7, %8, %cst_10 {dimension_numbers = #tpu.dot_dimension_numbers<[1], [0], [0], [1], [0, 0, 1, 1], [], []>} : vector<68x48xf32>, vector<48x32xf32>, vector<68x32xf32> -> vector<68x32xf32>
    %c0_11 = arith.constant 0 : index
    %c0_12 = arith.constant 0 : index
    %10 = vector.load %arg3[%c0_11, %c0_12] : memref<1x32xf32, #tpu.memory_space<vmem>>, vector<1x32xf32>
    %11 = vector.broadcast %10 : vector<1x32xf32> to vector<68x32xf32>
    %12 = arith.addf %9, %11 : vector<68x32xf32>
    %cst_13 = arith.constant 0.000000e+00 : f32
    %13 = vector.broadcast %cst_13 : f32 to vector<68x32xf32>
    %14 = arith.maximumf %12, %13 : vector<68x32xf32>
    %c0_14 = arith.constant 0 : index
    %c0_15 = arith.constant 0 : index
    %15 = vector.load %arg4[%c0_14, %c0_15] : memref<32x16xf32, #tpu.memory_space<vmem>>, vector<32x16xf32>
    %cst_16 = arith.constant dense<0.000000e+00> : vector<68x16xf32>
    %16 = tpu.matmul %14, %15, %cst_16 {dimension_numbers = #tpu.dot_dimension_numbers<[1], [0], [0], [1], [0, 0, 1, 1], [], []>} : vector<68x32xf32>, vector<32x16xf32>, vector<68x16xf32> -> vector<68x16xf32>
    %c0_17 = arith.constant 0 : index
    %c0_18 = arith.constant 0 : index
    %17 = vector.load %arg5[%c0_17, %c0_18] : memref<1x16xf32, #tpu.memory_space<vmem>>, vector<1x16xf32>
    %18 = vector.broadcast %17 : vector<1x16xf32> to vector<68x16xf32>
    %19 = arith.addf %16, %18 : vector<68x16xf32>
    %c0_19 = arith.constant 0 : index
    %c0_20 = arith.constant 0 : index
    %c0_21 = arith.constant 0 : index
    %20 = vector.load %arg6[%c0_19, %c0_20, %c0_21] : memref<1x68x16xf32, #tpu.memory_space<vmem>>, vector<1x68x16xf32>
    %21 = vector.shape_cast %20 : vector<1x68x16xf32> to vector<68x16xf32>
    %22 = vector.shape_cast %19 : vector<68x16xf32> to vector<1x68x16xf32>
    tpu.vector_store %arg6[%c0_19, %c0_20, %c0_21], %22 {strides = array<i32>} : memref<1x68x16xf32, #tpu.memory_space<vmem>>, vector<1x68x16xf32>,
    return
  }
  func.func @transform_0(%arg0: i32) -> (i32, i32, i32) {
    %c0_i32 = arith.constant 0 : i32
    %c0_i32_0 = arith.constant 0 : i32
    %c0_i32_1 = arith.constant 0 : i32
    return %arg0, %c0_i32, %c0_i32_0 : i32, i32, i32
  }
  func.func @transform_1(%arg0: i32) -> (i32, i32) {
    %c0_i32 = arith.constant 0 : i32
    %c0_i32_0 = arith.constant 0 : i32
    %c0_i32_1 = arith.constant 0 : i32
    return %c0_i32, %c0_i32_0 : i32, i32
  }
  func.func @transform_2(%arg0: i32) -> (i32, i32) {
    %c0_i32 = arith.constant 0 : i32
    %c0_i32_0 = arith.constant 0 : i32
    %c0_i32_1 = arith.constant 0 : i32
    return %c0_i32, %c0_i32_0 : i32, i32
  }
  func.func @transform_3(%arg0: i32) -> (i32, i32) {
    %c0_i32 = arith.constant 0 : i32
    %c0_i32_0 = arith.constant 0 : i32
    %c0_i32_1 = arith.constant 0 : i32
    return %c0_i32, %c0_i32_0 : i32, i32
  }
  func.func @transform_4(%arg0: i32) -> (i32, i32) {
    %c0_i32 = arith.constant 0 : i32
    %c0_i32_0 = arith.constant 0 : i32
    %c0_i32_1 = arith.constant 0 : i32
    return %c0_i32, %c0_i32_0 : i32, i32
  }
  func.func @transform_5(%arg0: i32) -> (i32, i32, i32) {
    %c0_i32 = arith.constant 0 : i32
    %c0_i32_0 = arith.constant 0 : i32
    %c0_i32_1 = arith.constant 0 : i32
    return %arg0, %c0_i32, %c0_i32_0 : i32, i32, i32
  }
}

</mosaic_0001>

<bundles_post_ra>
// kernel: tile.38
= control target key start
LH: loop header
LB: loop body
LE: loop exit
PB: predicated region body
PF: predicated region fallthrough
CT: control target
= control target key end

     0   :  { %s22_s0 = inlined_call_operand.vmem [shape: f32[8], index: 0, kind: input, shape index: {}]   ;;  %s23_s1 = inlined_call_operand.vmem [shape: f32[2,8], index: 1, kind: output, shape index: {}]  }
   0x1   :  { %v4_v0 = vld [vmem:[%s22_s0] ss:$0 sm:$0xff] }
   0x2   :  { %5 = vst [vmem:[%s23_s1] sm:$0x3] %v4_v0 }

// kernel: tile.39
= control target key start
LH: loop header
LB: loop body
LE: loop exit
PB: predicated region body
PF: predicated region fallthrough
CT: control target
= control target key end

     0   :  { %vm7_vm0 = vcmask 64512   ;;  %vm13_vm1 = vcmask 130112   ;;  %s39_s0 = inlined_call_operand.vmem [shape: f32[2,8], index: 0, kind: input, shape index: {}]   ;;  %s40_s1 = inlined_call_operand.vmem [shape: f32[1,16], index: 1, kind: output, shape index: {}]  }
   0x1   :  { %v4_v0 = vld [vmem:[%s39_s0] sm:$0x3]  ;;  %s22_s0 = smov 8  }
   0x2   :  { %5 = vst [vmem:[#allocation1] sm:$0x3] %v4_v0 }
   0x9   :  { %v10_v1 = vld [vmem:[#allocation1 + $0x1] sm:$0x1]   ;;  %v6_v2 = vld [vmem:[#allocation1] sm:$0x1]  }
   0xa   :  { %11 = vrot.lane.b32.xlu0 %v10_v1, %s22_s0  ;;  %8 = vst.msk [vmem:[#allocation0] sm:$0x1] %vm7_vm0, %v6_v2  }
  0x7c   :  { %v12_v3 = vpop.permute.xlu0 %11  }
  0x7d   :  { %14 = vst.msk [vmem:[#allocation0] sm:$0x1] %vm13_vm1, %v12_v3  }
  0x84   :  { %v18_v4 = vld [vmem:[#allocation0] sm:$0x1] }
  0x85   :  { %20 = vst [vmem:[%s40_s1] sm:$0x1] %v18_v4 }

// kernel: tile.54
= control target key start
LH: loop header
LB: loop body
LE: loop exit
PB: predicated region body
PF: predicated region fallthrough
CT: control target
= control target key end

     0   :  { %vm7_vm0 = vcmask 64512   ;;  %s37_s8 = smov 8   ;;  %s38_s9 = smov 16   ;;  %vm13_vm1 = vcmask 261312   ;;  %vm19_vm2 = vcmask 195712   ;;  %vm25_vm3 = vcmask 130112   ;;  %s55_s0 = inlined_call_operand.vmem [shape: f32[4,8], index: 0, kind: input, shape index: {}]   ;;  %s56_s1 = inlined_call_operand.vmem [shape: f32[1,32], index: 1, kind: output, shape index: {}]  }
   0x1   :  { %v4_v0 = vld [vmem:[%s55_s0] sm:$0xf]  ;;  %s36_s0 = smov 24  }
   0x2   :  { %5 = vst [vmem:[#allocation1] sm:$0xf] %v4_v0 }
   0x9   :  { %v10_v1 = vld [vmem:[#allocation1 + $0x3] sm:$0x1]   ;;  %v22_v2 = vld [vmem:[#allocation1 + $0x1] sm:$0x1]   ;;  %v6_v3 = vld [vmem:[#allocation1] sm:$0x1]  }
   0xa   :  { %11 = vrot.lane.b32.xlu0 %v10_v1, %s36_s0  ;;  %23 = vrot.lane.b32.xlu1 %v22_v2, %s37_s8  ;;  %v16_v4 = vld [vmem:[#allocation1 + $0x2] sm:$0x1]   ;;  %8 = vst.msk [vmem:[#allocation0] sm:$0x1] %vm7_vm0, %v6_v3  }
   0xe   :  { %17 = vrot.lane.b32.xlu0 %v16_v4, %s38_s9 }
  0x7c   :  { %v12_v5 = vpop.permute.xlu0 %11   ;;  %v24_v6 = vpop.permute.xlu1 %23  }
  0x7d   :  { %14 = vst.msk [vmem:[#allocation0] sm:$0x1] %vm13_vm1, %v12_v5  }
  0x80   :  { %v18_v7 = vpop.permute.xlu0 %17  }
  0x81   :  { %20 = vst.msk [vmem:[#allocation0] sm:$0x1] %vm19_vm2, %v18_v7  }
  0x82   :  { %26 = vst.msk [vmem:[#allocation0] sm:$0x1] %vm25_vm3, %v24_v6  }
  0x89   :  { %v30_v8 = vld [vmem:[#allocation0] sm:$0x1] }
  0x8a   :  { %32 = vst [vmem:[%s56_s1] sm:$0x1] %v30_v8 }

// kernel: tile.48
= control target key start
LH: loop header
LB: loop body
LE: loop exit
PB: predicated region body
PF: predicated region fallthrough
CT: control target
= control target key end

     0   :  { %s22_s0 = inlined_call_operand.vmem [shape: f32[16], index: 0, kind: input, shape index: {}]   ;;  %s23_s1 = inlined_call_operand.vmem [shape: f32[3,16], index: 1, kind: output, shape index: {}]  }
   0x1   :  { %v4_v0 = vld [vmem:[%s22_s0] ss:$0 sm:$0xff] }
   0x2   :  { %5 = vst [vmem:[%s23_s1] sm:$0xf] %v4_v0 }

// kernel: tile.53
= control target key start
LH: loop header
LB: loop body
LE: loop exit
PB: predicated region body
PF: predicated region fallthrough
CT: control target
= control target key end

     0   :  { %s22_s0 = inlined_call_operand.vmem [shape: f32[8], index: 0, kind: input, shape index: {}]   ;;  %s23_s1 = inlined_call_operand.vmem [shape: f32[4,8], index: 1, kind: output, shape index: {}]  }
   0x1   :  { %v4_v0 = vld [vmem:[%s22_s0] ss:$0 sm:$0xff] }
   0x2   :  { %5 = vst [vmem:[%s23_s1] sm:$0xf] %v4_v0 }

// kernel: tile.49
= control target key start
LH: loop header
LB: loop body
LE: loop exit
PB: predicated region body
PF: predicated region fallthrough
CT: control target
= control target key end

     0   :  { %vm7_vm0 = vcmask 130048   ;;  %s30_s8 = smov 16   ;;  %vm13_vm1 = vcmask 392448   ;;  %vm19_vm2 = vcmask 261248   ;;  %s47_s0 = inlined_call_operand.vmem [shape: f32[3,16], index: 0, kind: input, shape index: {}]   ;;  %s48_s1 = inlined_call_operand.vmem [shape: f32[1,48], index: 1, kind: output, shape index: {}]  }
   0x1   :  { %v4_v0 = vld [vmem:[%s47_s0] sm:$0xf]  ;;  %s29_s0 = smov 32  }
   0x2   :  { %5 = vst [vmem:[#allocation1] sm:$0xf] %v4_v0 }
   0x9   :  { %v10_v1 = vld [vmem:[#allocation1 + $0x2] sm:$0x1]   ;;  %v6_v2 = vld [vmem:[#allocation1] sm:$0x1]   ;;  %v16_v3 = vld [vmem:[#allocation1 + $0x1] sm:$0x1]  }
   0xa   :  { %11 = vrot.lane.b32.xlu0 %v10_v1, %s29_s0  ;;  %8 = vst.msk [vmem:[#allocation0] sm:$0x1] %vm7_vm0, %v6_v2  }
   0xe   :  { %17 = vrot.lane.b32.xlu0 %v16_v3, %s30_s8 }
  0x7c   :  { %v12_v4 = vpop.permute.xlu0 %11  }
  0x7d   :  { %14 = vst.msk [vmem:[#allocation0] sm:$0x1] %vm13_vm1, %v12_v4  }
  0x80   :  { %v18_v5 = vpop.permute.xlu0 %17  }
  0x81   :  { %20 = vst.msk [vmem:[#allocation0] sm:$0x1] %vm19_vm2, %v18_v5  }
  0x88   :  { %v24_v6 = vld [vmem:[#allocation0] sm:$0x1] }
  0x89   :  { %26 = vst [vmem:[%s48_s1] sm:$0x1] %v24_v6 }

// kernel: tile.58
= control target key start
LH: loop header
LB: loop body
LE: loop exit
PB: predicated region body
PF: predicated region fallthrough
CT: control target
= control target key end

     0   :  { %s22_s0 = inlined_call_operand.vmem [shape: f32[4], index: 0, kind: input, shape index: {}]   ;;  %s23_s1 = inlined_call_operand.vmem [shape: f32[4,4], index: 1, kind: output, shape index: {}]  }
   0x1   :  { %v4_v0 = vld [vmem:[%s22_s0] ss:$0 sm:$0xff] }
   0x2   :  { %5 = vst [vmem:[%s23_s1] sm:$0xf] %v4_v0 }

// kernel: tile.59
= control target key start
LH: loop header
LB: loop body
LE: loop exit
PB: predicated region body
PF: predicated region fallthrough
CT: control target
= control target key end

     0   :  { %vm7_vm0 = vcmask 31744   ;;  %s37_s8 = smov 4   ;;  %s38_s9 = smov 8   ;;  %vm13_vm1 = vcmask 130144   ;;  %vm19_vm2 = vcmask 97344   ;;  %vm25_vm3 = vcmask 64544   ;;  %s55_s0 = inlined_call_operand.vmem [shape: f32[4,4], index: 0, kind: input, shape index: {}]   ;;  %s56_s1 = inlined_call_operand.vmem [shape: f32[1,16], index: 1, kind: output, shape index: {}]  }
   0x1   :  { %v4_v0 = vld [vmem:[%s55_s0] sm:$0xf]  ;;  %s36_s0 = smov 12  }
   0x2   :  { %5 = vst [vmem:[#allocation1] sm:$0xf] %v4_v0 }
   0x9   :  { %v10_v1 = vld [vmem:[#allocation1 + $0x3] sm:$0x1]   ;;  %v22_v2 = vld [vmem:[#allocation1 + $0x1] sm:$0x1]   ;;  %v6_v3 = vld [vmem:[#allocation1] sm:$0x1]  }
   0xa   :  { %11 = vrot.lane.b32.xlu0 %v10_v1, %s36_s0  ;;  %23 = vrot.lane.b32.xlu1 %v22_v2, %s37_s8  ;;  %v16_v4 = vld [vmem:[#allocation1 + $0x2] sm:$0x1]   ;;  %8 = vst.msk [vmem:[#allocation0] sm:$0x1] %vm7_vm0, %v6_v3  }
   0xe   :  { %17 = vrot.lane.b32.xlu0 %v16_v4, %s38_s9 }
  0x7c   :  { %v12_v5 = vpop.permute.xlu0 %11   ;;  %v24_v6 = vpop.permute.xlu1 %23  }
  0x7d   :  { %14 = vst.msk [vmem:[#allocation0] sm:$0x1] %vm13_vm1, %v12_v5  }
  0x80   :  { %v18_v7 = vpop.permute.xlu0 %17  }
  0x81   :  { %20 = vst.msk [vmem:[#allocation0] sm:$0x1] %vm19_vm2, %v18_v7  }
  0x82   :  { %26 = vst.msk [vmem:[#allocation0] sm:$0x1] %vm25_vm3, %v24_v6  }
  0x89   :  { %v30_v8 = vld [vmem:[#allocation0] sm:$0x1] }
  0x8a   :  { %32 = vst [vmem:[%s56_s1] sm:$0x1] %v30_v8 }

// kernel: decoder_forward.3
= control target key start
LH: loop header
LB: loop body
LE: loop exit
PB: predicated region body
PF: predicated region fallthrough
CT: control target
= control target key end

     0   :  { %s463_s15 = smov 0   ;;  %s499_s0 = inlined_call_operand.vmem [shape: f32[2,8,4], index: 0, kind: input, shape index: {}]   ;;  %s500_s1 = inlined_call_operand.vmem [shape: f32[12,16], index: 1, kind: input, shape index: {}]   ;;  %s501_s2 = inlined_call_operand.vmem [shape: f32[1,16], index: 2, kind: input, shape index: {}]   ;;  %s502_s3 = inlined_call_operand.vmem [shape: f32[1,16], index: 3, kind: input, shape index: {}]   ;;  %s503_s4 = inlined_call_operand.vmem [shape: f32[2,10,16], index: 4, kind: output, shape index: {}]  }
   0x1 LB: > { %s381_s16 = sadd.s32 4294967295, %s432_s15   ;;  %p385_p0 = scmp.ge.s32.totalorder %s432_s15, 1  ;;  %s432_s15 = sphi %s463_s15, %s14_s15  }
   0x2   : > { %p161_p1 = scmp.lt.s32.totalorder %s432_s15, 3 }
   0x4   : > { %p162_p2 = pnand %p385_p0, %p161_p1 }
   0x5   : > { %p186_p3 = scmp.lt.s32.totalorder (!%p162_p2), %s381_s16, 1  ;;  %v215_v0 = vld [vmem:[%s500_s1] sm:$0xff] (!%p162_p2)  ;;  %v216_v1 = vld [vmem:[%s500_s1 + $0x8] sm:$0xf] (!%p162_p2)  ;;  %vm223_vm0 = vcmask (!%p162_p2), 1043456   ;;  %vm196_vm1 = vcmask (!%p162_p2), 97280  }
   0x6   : > { %165 = sbr.rel (%p162_p2) target bundleno = 365 (0x16d), region = 36  ;;  %v408_v2 = vpack.c.bf16 (!%p162_p2), %v216_v1, %v215_v0  ;;  %vm434_vm2 = vmmov (!%p162_p2), 1   ;;  %v435_v3 = vmov (!%p162_p2), 0.0   ;;  %vm198_vm4 = vcmask (!%p162_p2), 91136   ;;  %s436_s25 = smov (!%p162_p2), 4  }
   0x7   : > { %vm409_vm3 = vmpackc.low (!%p162_p2), %vm223_vm0, %vm434_vm2  ;;  %197 = vst.msk [vmem:[#allocation2] sm:$0xff] (!%p162_p2), %vm196_vm1, %v435_v3  ;;  %vm200_vm5 = vcmask (!%p162_p2), 31744   ;;  %s437_s26 = smov (!%p162_p2), 8   ;;  %vm206_vm6 = vcmask (!%p162_p2), 64544   ;;  %vm211_vm7 = vcmask (!%p162_p2), 97344   ;;  %vm324_vm8 = vcmask (!%p162_p2), 123904  }
   0x8   : > { %410 = vmatprep.subr.msk.bf16.mxu0 (!%p162_p2), %vm409_vm3, %v408_v2  ;;  %199 = vst.msk [vmem:[#allocation2 + $0x8] sm:$0x3] (!%p162_p2), %vm198_vm4, %v435_v3  ;;  %v392_v9 = vld [vmem:[%s501_s2] ss:$0 sm:$0xff] (!%p162_p2)  ;;  %vm322_vm9 = vcmask (!%p162_p2), 130048  }
   0x9   : > { %413 = vmatpush3.bf16.msk.msra.mxu0 (!%p162_p2), %vm409_vm3, %v408_v2  ;;  %v393_v11 = vld [vmem:[%s502_s3] ss:$0 sm:$0xff] (!%p162_p2) }
   0xd   : > { %s505_s16 = smov (!%p186_p3, %s381_s16), 1 }
   0xe   : > { %s386_s21 = sshll.u32 %s505_s16, 3  ;;  %s396_s5 = sshll.u32 %s505_s16, 4 }
   0xf   : > { %s189_s24 = scalar_lea.vmem %s499_s0, %s386_s21  ;;  %s194_s8 = scalar_lea.vmem %s503_s4, %s396_s5 }
  0x10   : > { %v195_v4 = vld [vmem:[%s189_s24] sm:$0xff] }
  0x11   : > { %203 = vrot.lane.b32.xlu0 %v195_v4, %s436_s25  ;;  %201 = vst.msk [vmem:[#allocation2] sm:$0xff] %vm200_vm5, %v195_v4 }
  0x15   : > { %208 = vrot.lane.b32.xlu0 %v195_v4, %s437_s26 }
  0x83   : > { %v204_v5 = vpop.permute.xlu0 %203 }
  0x84   : > { %207 = vst.msk [vmem:[#allocation2 + $0x1] sm:$0xff] %vm206_vm6, %v204_v5 }
  0x87   : > { %v209_v6 = vpop.permute.xlu0 %208 }
  0x88   : > { %212 = vst.msk [vmem:[#allocation2 + $0x2] sm:$0xff] %vm211_vm7, %v209_v6 }
  0x8f   : > { %v213_v7 = vld [vmem:[#allocation2] sm:$0xff]  ;;  %v214_v8 = vld [vmem:[#allocation2 + $0x8] sm:$0x3] }
  0x90   : > { %405 = vmatprep.mubr.msk.f32.mxu0 %vm196_vm1, %v213_v7 }
  0x91   : > { %406 = vmatmul.mubr.msk.f32.vlgmr.msra.gmra.mrb[0].mxu0 %vm196_vm1, %v214_v8 }
 0x164   : > { %v407_v10 = vpop.f32.mrb[0].mxu0 }
 0x165   : > { %v310_v12 = vmul.f32 %v407_v10, %v392_v9  ;;  %v293_v13 = vpop.f32.mrb[1].mxu0 }
 0x166   : > { %v309_v14 = vmul.f32 %v392_v9, %v293_v13 }
 0x167   : > { %v319_v15 = vadd.f32 %v393_v11, %v310_v12 }
 0x168   : > { %v318_v16 = vadd.f32 %v393_v11, %v309_v14 }
 0x169   : > { %v321_v17 = vmax.f32 %v319_v15, 0.0 }
 0x16a   : > { %v320_v18 = vmax.f32 %v318_v16, 0.0 }
 0x16b   : > { %325 = vst.msk [vmem:[%s194_s8 + $0x8] sm:$0x3] %vm324_vm8, %v321_v17 }
 0x16c   : > { %323 = vst.msk [vmem:[%s194_s8] sm:$0xff] %vm322_vm9, %v320_v18 }
 0x16d PF: > { %s14_s15 = sadd.s32 1, %s432_s15  }
 0x16e   : > { %p11_p4 = scmp.ge.s32.totalorder %s14_s15, 4  }
 0x170   :  { %13 = sbr.rel (!%p11_p4) target bundleno = 1 (0x1), region = 66 }

// kernel: decoder_forward.4
= control target key start
LH: loop header
LB: loop body
LE: loop exit
PB: predicated region body
PF: predicated region fallthrough
CT: control target
= control target key end

     0   :  { %s514_s15 = smov 0   ;;  %s561_s0 = inlined_call_operand.vmem [shape: f32[2,20,8], index: 0, kind: input, shape index: {}]   ;;  %s562_s1 = inlined_call_operand.vmem [shape: f32[24,48], index: 1, kind: input, shape index: {}]   ;;  %s563_s2 = inlined_call_operand.vmem [shape: f32[1,48], index: 2, kind: input, shape index: {}]   ;;  %s564_s3 = inlined_call_operand.vmem [shape: f32[1,48], index: 3, kind: input, shape index: {}]   ;;  %s565_s4 = inlined_call_operand.vmem [shape: f32[2,22,48], index: 4, kind: output, shape index: {}]  }
   0x1 LB: > { %s420_s16 = sadd.s32 4294967295, %s482_s15   ;;  %p424_p0 = scmp.ge.s32.totalorder %s482_s15, 1  ;;  %s482_s15 = sphi %s514_s15, %s14_s15  }
   0x2   : > { %p162_p1 = scmp.lt.s32.totalorder %s482_s15, 3 }
   0x4   : > { %p163_p2 = pnand %p424_p0, %p162_p1 }
   0x5   : > { %p188_p3 = scmp.lt.s32.totalorder (!%p163_p2), %s420_s16, 1  ;;  %vm204_vm0 = vcmask (!%p163_p2), 193536   ;;  %vm201_vm1 = vcmask (!%p163_p2), 195584   ;;  %v484_v0 = vmov (!%p163_p2), 0.0   ;;  %v245_v1 = vld [vmem:[%s562_s1] sm:$0xff] (!%p163_p2)  ;;  %v246_v2 = vld [vmem:[%s562_s1 + $0x8] sm:$0xff] (!%p163_p2) }
   0x6   : > { %166 = sbr.rel (%p163_p2) target bundleno = 373 (0x175), region = 36  ;;  %205 = vst.msk [vmem:[#allocation2 + $0x10] sm:$0x3f] (!%p163_p2), %vm204_vm0, %v484_v0  ;;  %v485_v3 = vmov (!%p163_p2), 0.0|0.0   ;;  %v456_v4 = vpack.c.bf16 (!%p163_p2), %v246_v2, %v245_v1  ;;  %vm486_vm2 = vmmov (!%p163_p2), 0   ;;  %vm209_vm3 = vcmask (!%p163_p2), 60416  }
   0x7   : > { %202 = vst.msk [vmem:[#allocation2] sm:$0xff] (!%p163_p2), %vm201_vm1, %v484_v0  ;;  %203 = vst.msk [vmem:[#allocation2 + $0x8] sm:$0xff] (!%p163_p2), %vm201_vm1, %v484_v0  ;;  %455 = vmatprep.subr.bf16.mxu0 (!%p163_p2), %v485_v3  ;;  %458 = vmatprep.subr.bf16.mxu1 (!%p163_p2), %v485_v3  ;;  %vm206_vm4 = vcmask (!%p163_p2), 64512   ;;  %v247_v5 = vld [vmem:[%s562_s1 + $0x10] sm:$0xff] (!%p163_p2)  ;;  %s487_s27 = smov (!%p163_p2), 8   ;;  %s488_s28 = smov (!%p163_p2), 16  }
   0x8   : > { %446 = vmatprep.mubr.msk.f32.mxu0 (!%p163_p2), %vm486_vm2, %v484_v0  ;;  %449 = vmatprep.mubr.msk.f32.mxu1 (!%p163_p2), %vm486_vm2, %v484_v0  ;;  %vm226_vm5 = vcmask (!%p163_p2), 126016   ;;  %vm223_vm6 = vcmask (!%p163_p2), 130112   ;;  %vm237_vm7 = vcmask (!%p163_p2), 195712   ;;  %vm240_vm8 = vcmask (!%p163_p2), 191616   ;;  %v430_v18 = vld [vmem:[%s563_s2] ss:$0 sm:$0xff] (!%p163_p2) }
   0x9   : > { %457 = vmatpush3.bf16.msra.mxu0 (!%p163_p2), %v456_v4  ;;  %460 = vmatpush3.bf16.msra.mxu1 (!%p163_p2), %v456_v4  ;;  %v431_v20 = vld [vmem:[%s564_s3] ss:$0 sm:$0xff] (!%p163_p2)  ;;  %vm360_vm9 = vcmask (!%p163_p2), 392192   ;;  %vm363_vm10 = vcmask (!%p163_p2), 390144  }
   0xa   : > { %444 = vmatprep.subr.mxu0 (!%p163_p2), %v484_v0  ;;  %459 = vmatprep.subr.mxu1 (!%p163_p2), %v484_v0 }
   0xd   : > { %s567_s16 = smov (!%p188_p3, %s420_s16), 1  ;;  %445 = vmatpush3.msra.mxu0 %v247_v5  ;;  %461 = vmatpush3.msra.mxu1 %v247_v5 }
   0xe   : > { %s462_s21 = smul.u32 24, %s567_s16 }
  0x10   : > { %s192_s24 = scalar_lea.vmem %s561_s0, %s462_s21  ;;  %s197_s9 = scalar_lea.vmem %s565_s4, %s462_s21 }
  0x11   : > { %v200_v6 = vld [vmem:[%s192_s24 + $0x10] sm:$0xf]  ;;  %v198_v7 = vld [vmem:[%s192_s24] sm:$0xff]  ;;  %v199_v8 = vld [vmem:[%s192_s24 + $0x8] sm:$0xff] }
  0x12   : > { %218 = vrot.lane.b32.xlu1 %v200_v6, %s487_s27  ;;  %210 = vst.msk [vmem:[#allocation2 + $0x10] sm:$0xf] %vm209_vm3, %v200_v6  ;;  %214 = vrot.lane.b32.xlu0 %v198_v7, %s487_s27 }
  0x13   : > { %207 = vst.msk [vmem:[#allocation2] sm:$0xff] %vm206_vm4, %v198_v7  ;;  %208 = vst.msk [vmem:[#allocation2 + $0x8] sm:$0xff] %vm206_vm4, %v199_v8 }
  0x16   : > { %228 = vrot.lane.b32.xlu1 %v198_v7, %s488_s28  ;;  %216 = vrot.lane.b32.xlu0 %v199_v8, %s487_s27 }
  0x1a   : > { %232 = vrot.lane.b32.xlu1 %v200_v6, %s488_s28  ;;  %230 = vrot.lane.b32.xlu0 %v199_v8, %s488_s28 }
  0x84   : > { %v219_v9 = vpop.permute.xlu1 %218  ;;  %v215_v10 = vpop.permute.xlu0 %214 }
  0x85   : > { %227 = vst.msk [vmem:[#allocation2 + $0x11] sm:$0xf] %vm226_vm5, %v219_v9 }
  0x86   : > { %224 = vst.msk [vmem:[#allocation2 + $0x1] sm:$0xff] %vm223_vm6, %v215_v10 }
  0x88   : > { %v229_v11 = vpop.permute.xlu1 %228  ;;  %v217_v12 = vpop.permute.xlu0 %216 }
  0x89   : > { %225 = vst.msk [vmem:[#allocation2 + $0x9] sm:$0xff] %vm223_vm6, %v217_v12 }
  0x8a   : > { %238 = vst.msk [vmem:[#allocation2 + $0x2] sm:$0xff] %vm237_vm7, %v229_v11 }
  0x8c   : > { %v233_v13 = vpop.permute.xlu1 %232  ;;  %v231_v14 = vpop.permute.xlu0 %230 }
  0x8d   : > { %241 = vst.msk [vmem:[#allocation2 + $0x12] sm:$0xf] %vm240_vm8, %v233_v13 }
  0x8e   : > { %239 = vst.msk [vmem:[#allocation2 + $0xa] sm:$0xff] %vm237_vm7, %v231_v14 }
  0x91   : > { %v242_v15 = vld [vmem:[#allocation2] sm:$0xff] }
  0x92   : > { %447 = vmatmul.mubr.msk.f32.vlgmr.msra.gmra.mrb[0].mxu0 %vm201_vm1, %v242_v15 }
  0x95   : > { %v243_v16 = vld [vmem:[#allocation2 + $0x8] sm:$0xff]  ;;  %v244_v17 = vld [vmem:[#allocation2 + $0x10] sm:$0x3f] }
  0x96   : > { %450 = vmatmul.mubr.msk.f32.vlgmr.msra.gmra.mrb[0].mxu1 %vm201_vm1, %v243_v16 }
  0x97   : > { %452 = vmatprep.mubr.msk.f32.mxu1 %vm486_vm2, %v484_v0 }
  0x9a   : > { %453 = vmatmul.mubr.msk.f32.gmra.mrb[2].mxu1 %vm201_vm1, %v244_v17 }
 0x165   : > { %v323_v19 = vpop.f32.mrb[0].mxu0 }
 0x166   : > { %v344_v21 = vmul.f32 %v430_v18, %v323_v19  ;;  %v448_v22 = vpop.f32.mrb[1].mxu0 }
 0x168   : > { %v354_v23 = vadd.f32 %v431_v20, %v344_v21 }
 0x169   : > { %v328_v24 = vpop.f32.mrb[0].mxu1 }
 0x16a   : > { %v345_v25 = vmul.f32 %v430_v18, %v328_v24  ;;  %v451_v26 = vpop.f32.mrb[1].mxu1  ;;  %v357_v27 = vmax.f32 %v354_v23, 0.0 }
 0x16c   : > { %v355_v28 = vadd.f32 %v431_v20, %v345_v25  ;;  %361 = vst.msk [vmem:[%s197_s9] sm:$0xff] %vm360_vm9, %v357_v27 }
 0x16d   : > { %v333_v29 = vpop.f32.mrb[2].mxu1 }
 0x16e   : > { %v358_v30 = vmax.f32 %v355_v28, 0.0  ;;  %v346_v31 = vmul.f32 %v430_v18, %v333_v29  ;;  %v454_v32 = vpop.f32.mrb[3].mxu1 }
 0x170   : > { %362 = vst.msk [vmem:[%s197_s9 + $0x8] sm:$0xff] %vm360_vm9, %v358_v30  ;;  %v356_v33 = vadd.f32 %v431_v20, %v346_v31 }
 0x172   : > { %v359_v34 = vmax.f32 %v356_v33, 0.0 }
 0x174   : > { %364 = vst.msk [vmem:[%s197_s9 + $0x10] sm:$0x3f] %vm363_vm10, %v359_v34 }
 0x175 PF: > { %s14_s15 = sadd.s32 1, %s482_s15  }
 0x176   : > { %p11_p4 = scmp.ge.s32.totalorder %s14_s15, 4  }
 0x178   :  { %13 = sbr.rel (!%p11_p4) target bundleno = 1 (0x1), region = 66 }

// kernel: decoder_forward.5
= control target key start
LH: loop header
LB: loop body
LE: loop exit
PB: predicated region body
PF: predicated region fallthrough
CT: control target
= control target key end

     0   :  { %s926_s18 = smov 0   ;;  %s1129_s0 = inlined_call_operand.vmem [shape: f32[2,66,16], index: 0, kind: input, shape index: {}]   ;;  %s1130_s1 = inlined_call_operand.vmem [shape: f32[48,32], index: 1, kind: input, shape index: {}]   ;;  %s1131_s2 = inlined_call_operand.vmem [shape: f32[1,32], index: 2, kind: input, shape index: {}]   ;;  %s1132_s3 = inlined_call_operand.vmem [shape: f32[32,16], index: 3, kind: input, shape index: {}]   ;;  %s1133_s4 = inlined_call_operand.vmem [shape: f32[1,16], index: 4, kind: input, shape index: {}]   ;;  %s1134_s5 = inlined_call_operand.vmem [shape: f32[2,68,16], index: 5, kind: output, shape index: {}]  }
   0x1 LB: > { %s723_s19 = sadd.s32 4294967295, %s889_s18   ;;  %p727_p0 = scmp.ge.s32.totalorder %s889_s18, 1  ;;  %s889_s18 = sphi %s926_s18, %s15_s18  }
   0x2   : > { %p187_p1 = scmp.lt.s32.totalorder %s889_s18, 3 }
   0x4   : > { %p188_p2 = pnand %p727_p0, %p187_p1 }
   0x5   : > { %p934_p3 = scmp.lt.s32.totalorder (!%p188_p2), %s723_s19, 1  ;;  %vm234_vm0 = vcmask (!%p188_p2), 392192   ;;  %vm243_vm1 = vcmask (!%p188_p2), 388096   ;;  %v891_v0 = vmov (!%p188_p2), 0.0   ;;  %v350_v1 = vld [vmem:[%s1130_s1] sm:$0xff] (!%p188_p2)  ;;  %v351_v2 = vld [vmem:[%s1130_s1 + $0x8] sm:$0xff] (!%p188_p2) }
   0x6   : > { %191 = sbr.rel (%p188_p2) target bundleno = 609 (0x261), region = 40  ;;  %235 = vst.msk [vmem:[#allocation2] sm:$0xff] (!%p188_p2), %vm234_vm0, %v891_v0  ;;  %236 = vst.msk [vmem:[#allocation2 + $0x8] sm:$0xff] (!%p188_p2), %vm234_vm0, %v891_v0  ;;  %v892_v3 = vmov (!%p188_p2), 0.0|0.0   ;;  %v855_v4 = vpack.c.bf16 (!%p188_p2), %v351_v2, %v350_v1  ;;  %v352_v5 = vld [vmem:[%s1130_s1 + $0x10] sm:$0xff] (!%p188_p2)  ;;  %v353_v6 = vld [vmem:[%s1130_s1 + $0x18] sm:$0xff] (!%p188_p2) }
   0x7   : > { %237 = vst.msk [vmem:[#allocation2 + $0x10] sm:$0xff] (!%p188_p2), %vm234_vm0, %v891_v0  ;;  %238 = vst.msk [vmem:[#allocation2 + $0x18] sm:$0xff] (!%p188_p2), %vm234_vm0, %v891_v0  ;;  %854 = vmatprep.subr.bf16.mxu0 (!%p188_p2), %v892_v3  ;;  %863 = vmatprep.subr.bf16.mxu1 (!%p188_p2), %v892_v3  ;;  %vm245_vm2 = vcmask (!%p188_p2), 130048   ;;  %v858_v7 = vpack.c.bf16 (!%p188_p2), %v353_v6, %v352_v5  ;;  %v354_v8 = vld [vmem:[%s1130_s1 + $0x20] sm:$0xff] (!%p188_p2)  ;;  %v355_v9 = vld [vmem:[%s1130_s1 + $0x28] sm:$0xff] (!%p188_p2)  ;;  %vm893_vm3 = vmmov (!%p188_p2), 0  }
   0x8   : > { %239 = vst.msk [vmem:[#allocation2 + $0x20] sm:$0xff] (!%p188_p2), %vm234_vm0, %v891_v0  ;;  %240 = vst.msk [vmem:[#allocation2 + $0x28] sm:$0xff] (!%p188_p2), %vm234_vm0, %v891_v0  ;;  %856 = vmatpush3.bf16.msra.mxu0 (!%p188_p2), %v855_v4  ;;  %792 = vmatprep.mubr.msk.f32.mxu0 (!%p188_p2), %vm893_vm3, %v891_v0  ;;  %s894_s12 = smov (!%p188_p2), 16   ;;  %s895_s13 = smov (!%p188_p2), 32   ;;  %vm254_vm4 = vcmask (!%p188_p2), 123904   ;;  %v861_v18 = vpack.c.bf16 (!%p188_p2), %v355_v9, %v354_v8  ;;  %v509_v20 = vld [vmem:[%s1132_s3] sm:$0xff] (!%p188_p2) }
   0x9   : > { %241 = vst.msk [vmem:[#allocation2 + $0x30] sm:$0xff] (!%p188_p2), %vm234_vm0, %v891_v0  ;;  %242 = vst.msk [vmem:[#allocation2 + $0x38] sm:$0xff] (!%p188_p2), %vm234_vm0, %v891_v0  ;;  %857 = vmatprep.subr.bf16.mxu0 (!%p188_p2), %v892_v3  ;;  %827 = vmatprep.mubr.msk.f32.mxu1 (!%p188_p2), %vm893_vm3, %v891_v0  ;;  %v510_v21 = vld [vmem:[%s1132_s3 + $0x8] sm:$0xff] (!%p188_p2)  ;;  %vm292_vm5 = vcmask (!%p188_p2), 261248   ;;  %vm330_vm6 = vcmask (!%p188_p2), 392448   ;;  %vm301_vm7 = vcmask (!%p188_p2), 255104  }
   0xa   : > { %244 = vst.msk [vmem:[#allocation2 + $0x40] sm:$0xf] (!%p188_p2), %vm243_vm1, %v891_v0  ;;  %v864_v22 = vpack.c.bf16 (!%p188_p2), %v510_v21, %v509_v20  ;;  %vm339_vm8 = vcmask (!%p188_p2), 386304   ;;  %v511_v50 = vld [vmem:[%s1132_s3 + $0x10] sm:$0xff] (!%p188_p2)  ;;  %v512_v51 = vld [vmem:[%s1132_s3 + $0x18] sm:$0xff] (!%p188_p2)  ;;  %vm520_vm9 = vcmask (!%p188_p2), 261120  }
   0xb   : > { %v867_v52 = vpack.c.bf16 (!%p188_p2), %v512_v51, %v511_v50  ;;  %v730_v53 = vld [vmem:[%s1131_s2] ss:$0 sm:$0xff] (!%p188_p2)  ;;  %vm666_vm10 = vcmask (!%p188_p2), 125952  }
   0xc   : > { %859 = vmatpush3.bf16.msra.mxu0 (!%p188_p2), %v858_v7  ;;  %865 = vmatpush3.bf16.msra.mxu1 (!%p188_p2), %v864_v22 }
   0xd   : > { %s1137_s19 = smov (!%p934_p3, %s723_s19), 1  ;;  %860 = vmatprep.subr.bf16.mxu0 %v892_v3  ;;  %866 = vmatprep.subr.bf16.mxu1 %v892_v3 }
   0xe   : > { %s869_s29 = smul.u32 72, %s1137_s19 }
  0x10   : > { %s219_s7 = scalar_lea.vmem %s1129_s0, %s869_s29  ;;  %862 = vmatpush3.bf16.msra.mxu0 %v861_v18  ;;  %868 = vmatpush3.bf16.msra.mxu1 %v867_v52  ;;  %s1107_s6 = scalar_lea.vmem %s1134_s5, %s869_s29 }
  0x11   : > { %v225_v10 = vld [vmem:[%s219_s7] sm:$0xff]  ;;  %v226_v11 = vld [vmem:[%s219_s7 + $0x8] sm:$0xff]  ;;  %v227_v12 = vld [vmem:[%s219_s7 + $0x10] sm:$0xff] }
  0x12   : > { %265 = vrot.lane.b32.xlu0 %v225_v10, %s894_s12  ;;  %246 = vst.msk [vmem:[#allocation2] sm:$0xff] %vm245_vm2, %v225_v10  ;;  %303 = vrot.lane.b32.xlu1 %v225_v10, %s895_s13  ;;  %247 = vst.msk [vmem:[#allocation2 + $0x8] sm:$0xff] %vm245_vm2, %v226_v11  ;;  %v228_v13 = vld [vmem:[%s219_s7 + $0x18] sm:$0xff]  ;;  %v229_v14 = vld [vmem:[%s219_s7 + $0x20] sm:$0xff] }
  0x13   : > { %248 = vst.msk [vmem:[#allocation2 + $0x10] sm:$0xff] %vm245_vm2, %v227_v12  ;;  %249 = vst.msk [vmem:[#allocation2 + $0x18] sm:$0xff] %vm245_vm2, %v228_v13  ;;  %v230_v15 = vld [vmem:[%s219_s7 + $0x28] sm:$0xff]  ;;  %v231_v16 = vld [vmem:[%s219_s7 + $0x30] sm:$0xff] }
  0x14   : > { %250 = vst.msk [vmem:[#allocation2 + $0x20] sm:$0xff] %vm245_vm2, %v229_v14  ;;  %v232_v17 = vld [vmem:[%s219_s7 + $0x38] sm:$0xff]  ;;  %251 = vst.msk [vmem:[#allocation2 + $0x28] sm:$0xff] %vm245_vm2, %v230_v15  ;;  %v233_v19 = vld [vmem:[%s219_s7 + $0x40] sm:$0x3] }
  0x15   : > { %252 = vst.msk [vmem:[#allocation2 + $0x30] sm:$0xff] %vm245_vm2, %v231_v16  ;;  %253 = vst.msk [vmem:[#allocation2 + $0x38] sm:$0xff] %vm245_vm2, %v232_v17 }
  0x16   : > { %255 = vst.msk [vmem:[#allocation2 + $0x40] sm:$0x3] %vm254_vm4, %v233_v19  ;;  %267 = vrot.lane.b32.xlu0 %v226_v11, %s894_s12  ;;  %269 = vrot.lane.b32.xlu1 %v227_v12, %s894_s12 }
  0x1a   : > { %305 = vrot.lane.b32.xlu0 %v226_v11, %s895_s13  ;;  %271 = vrot.lane.b32.xlu1 %v228_v13, %s894_s12 }
  0x1e   : > { %307 = vrot.lane.b32.xlu0 %v227_v12, %s895_s13  ;;  %273 = vrot.lane.b32.xlu1 %v229_v14, %s894_s12 }
  0x22   : > { %309 = vrot.lane.b32.xlu0 %v228_v13, %s895_s13  ;;  %275 = vrot.lane.b32.xlu1 %v230_v15, %s894_s12 }
  0x26   : > { %311 = vrot.lane.b32.xlu0 %v229_v14, %s895_s13  ;;  %277 = vrot.lane.b32.xlu1 %v231_v16, %s894_s12 }
  0x2a   : > { %313 = vrot.lane.b32.xlu0 %v230_v15, %s895_s13  ;;  %279 = vrot.lane.b32.xlu1 %v232_v17, %s894_s12 }
  0x2e   : > { %315 = vrot.lane.b32.xlu0 %v231_v16, %s895_s13  ;;  %281 = vrot.lane.b32.xlu1 %v233_v19, %s894_s12 }
  0x32   : > { %317 = vrot.lane.b32.xlu0 %v232_v17, %s895_s13  ;;  %319 = vrot.lane.b32.xlu1 %v233_v19, %s895_s13 }
  0x84   : > { %v266_v23 = vpop.permute.xlu0 %265  ;;  %v304_v24 = vpop.permute.xlu1 %303 }
  0x85   : > { %293 = vst.msk [vmem:[#allocation2 + $0x1] sm:$0xff] %vm292_vm5, %v266_v23 }
  0x88   : > { %v268_v25 = vpop.permute.xlu0 %267  ;;  %v270_v26 = vpop.permute.xlu1 %269 }
  0x89   : > { %294 = vst.msk [vmem:[#allocation2 + $0x9] sm:$0xff] %vm292_vm5, %v268_v25  ;;  %295 = vst.msk [vmem:[#allocation2 + $0x11] sm:$0xff] %vm292_vm5, %v270_v26 }
  0x8a   : > { %331 = vst.msk [vmem:[#allocation2 + $0x2] sm:$0xff] %vm330_vm6, %v304_v24 }
  0x8c   : > { %v306_v27 = vpop.permute.xlu0 %305  ;;  %v272_v28 = vpop.permute.xlu1 %271 }
  0x8d   : > { %332 = vst.msk [vmem:[#allocation2 + $0xa] sm:$0xff] %vm330_vm6, %v306_v27  ;;  %v740_v27 = vld [vmem:[%s1133_s4] ss:$0 sm:$0xff] }
  0x8e   : > { %296 = vst.msk [vmem:[#allocation2 + $0x19] sm:$0xff] %vm292_vm5, %v272_v28 }
  0x90   : > { %v308_v29 = vpop.permute.xlu0 %307  ;;  %v274_v30 = vpop.permute.xlu1 %273 }
  0x91   : > { %333 = vst.msk [vmem:[#allocation2 + $0x12] sm:$0xff] %vm330_vm6, %v308_v29  ;;  %v341_v31 = vld [vmem:[#allocation2] sm:$0xff] }
  0x92   : > { %297 = vst.msk [vmem:[#allocation2 + $0x21] sm:$0xff] %vm292_vm5, %v274_v30  ;;  %793 = vmatmul.mubr.msk.f32.vlgmr.msra.gmra.mrb[0].mxu0 %vm234_vm0, %v341_v31 }
  0x93   : > { %795 = vmatprep.mubr.msk.f32.mxu0 %vm893_vm3, %v891_v0 }
  0x94   : > { %v310_v32 = vpop.permute.xlu0 %309  ;;  %v276_v33 = vpop.permute.xlu1 %275  ;;  %v342_v34 = vld [vmem:[#allocation2 + $0x8] sm:$0xff] }
  0x95   : > { %334 = vst.msk [vmem:[#allocation2 + $0x1a] sm:$0xff] %vm330_vm6, %v310_v32 }
  0x96   : > { %298 = vst.msk [vmem:[#allocation2 + $0x29] sm:$0xff] %vm292_vm5, %v276_v33  ;;  %796 = vmatmul.mubr.msk.f32.gmra.mrb[2].mxu0 %vm234_vm0, %v342_v34 }
  0x97   : > { %798 = vmatprep.mubr.msk.f32.mxu0 %vm893_vm3, %v891_v0 }
  0x98   : > { %v312_v35 = vpop.permute.xlu0 %311  ;;  %v278_v36 = vpop.permute.xlu1 %277  ;;  %v343_v37 = vld [vmem:[#allocation2 + $0x10] sm:$0xff] }
  0x99   : > { %335 = vst.msk [vmem:[#allocation2 + $0x22] sm:$0xff] %vm330_vm6, %v312_v35 }
  0x9a   : > { %299 = vst.msk [vmem:[#allocation2 + $0x31] sm:$0xff] %vm292_vm5, %v278_v36  ;;  %799 = vmatmul.mubr.msk.f32.gmra.mrb[4].mxu0 %vm234_vm0, %v343_v37 }
  0x9b   : > { %801 = vmatprep.mubr.msk.f32.mxu0 %vm893_vm3, %v891_v0 }
  0x9c   : > { %v314_v38 = vpop.permute.xlu0 %313  ;;  %v280_v39 = vpop.permute.xlu1 %279  ;;  %v344_v40 = vld [vmem:[#allocation2 + $0x18] sm:$0xff] }
  0x9d   : > { %336 = vst.msk [vmem:[#allocation2 + $0x2a] sm:$0xff] %vm330_vm6, %v314_v38 }
  0x9e   : > { %300 = vst.msk [vmem:[#allocation2 + $0x39] sm:$0xff] %vm292_vm5, %v280_v39  ;;  %802 = vmatmul.mubr.msk.f32.gmra.mrb[6].mxu0 %vm234_vm0, %v344_v40 }
  0x9f   : > { %804 = vmatprep.mubr.msk.f32.mxu0 %vm893_vm3, %v891_v0 }
  0xa0   : > { %v316_v41 = vpop.permute.xlu0 %315  ;;  %v282_v42 = vpop.permute.xlu1 %281  ;;  %v345_v43 = vld [vmem:[#allocation2 + $0x20] sm:$0xff] }
  0xa1   : > { %337 = vst.msk [vmem:[#allocation2 + $0x32] sm:$0xff] %vm330_vm6, %v316_v41 }
  0xa2   : > { %302 = vst.msk [vmem:[#allocation2 + $0x41] sm:$0x3] %vm301_vm7, %v282_v42  ;;  %805 = vmatmul.mubr.msk.f32.gmra.mrb[8].mxu0 %vm234_vm0, %v345_v43 }
  0xa3   : > { %807 = vmatprep.mubr.msk.f32.mxu0 %vm893_vm3, %v891_v0 }
  0xa4   : > { %v318_v44 = vpop.permute.xlu0 %317  ;;  %v320_v45 = vpop.permute.xlu1 %319  ;;  %v346_v46 = vld [vmem:[#allocation2 + $0x28] sm:$0xff] }
  0xa5   : > { %338 = vst.msk [vmem:[#allocation2 + $0x3a] sm:$0xff] %vm330_vm6, %v318_v44 }
  0xa6   : > { %340 = vst.msk [vmem:[#allocation2 + $0x42] sm:$0x3] %vm339_vm8, %v320_v45  ;;  %808 = vmatmul.mubr.msk.f32.gmra.mrb[10].mxu0 %vm234_vm0, %v346_v46 }
  0xa7   : > { %810 = vmatprep.mubr.msk.f32.mxu0 %vm893_vm3, %v891_v0 }
  0xa8   : > { %v347_v47 = vld [vmem:[#allocation2 + $0x30] sm:$0xff] }
  0xaa   : > { %811 = vmatmul.mubr.msk.f32.gmra.mrb[12].mxu0 %vm234_vm0, %v347_v47 }
  0xab   : > { %813 = vmatprep.mubr.msk.f32.mxu0 %vm893_vm3, %v891_v0 }
  0xac   : > { %v348_v48 = vld [vmem:[#allocation2 + $0x38] sm:$0xff] }
  0xad   : > { %v349_v49 = vld [vmem:[#allocation2 + $0x40] sm:$0xf] }
  0xae   : > { %814 = vmatmul.mubr.msk.f32.gmra.mrb[14].mxu0 %vm234_vm0, %v348_v48 }
  0xaf   : > { %816 = vmatprep.mubr.msk.f32.mxu0 %vm893_vm3, %v891_v0 }
  0xb2   : > { %817 = vmatmul.mubr.msk.f32.gmra.mrb[16].mxu0 %vm234_vm0, %v349_v49 }
 0x165   : > { %v456_v54 = vpop.f32.mrb[0].mxu0 }
 0x166   : > { %v457_v55 = vadd.f32 %v730_v53, %v456_v54  ;;  %v794_v56 = vpop.f32.mrb[1].mxu0 }
 0x168   : > { %v500_v57 = vmax.f32 %v457_v55, 0.0 }
 0x169   : > { %v461_v58 = vpop.f32.mrb[2].mxu0 }
 0x16a   : > { %v462_v59 = vadd.f32 %v730_v53, %v461_v58  ;;  %v797_v60 = vpop.f32.mrb[3].mxu0  ;;  %828 = vmatmul.mubr.msk.f32.vlgmr.msra.gmra.mrb[0].mxu1 %vm520_vm9, %v500_v57 }
 0x16b   : > { %830 = vmatprep.mubr.msk.f32.mxu1 %vm893_vm3, %v891_v0 }
 0x16c   : > { %v501_v61 = vmax.f32 %v462_v59, 0.0 }
 0x16d   : > { %v466_v62 = vpop.f32.mrb[4].mxu0 }
 0x16e   : > { %v467_v63 = vadd.f32 %v730_v53, %v466_v62  ;;  %v800_v1 = vpop.f32.mrb[5].mxu0  ;;  %831 = vmatmul.mubr.msk.f32.gmra.mrb[2].mxu1 %vm520_vm9, %v501_v61 }
 0x16f   : > { %833 = vmatprep.mubr.msk.f32.mxu1 %vm893_vm3, %v891_v0 }
 0x170   : > { %v502_v2 = vmax.f32 %v467_v63, 0.0 }
 0x171   : > { %v471_v3 = vpop.f32.mrb[6].mxu0 }
 0x172   : > { %v472_v4 = vadd.f32 %v730_v53, %v471_v3  ;;  %v803_v5 = vpop.f32.mrb[7].mxu0  ;;  %834 = vmatmul.mubr.msk.f32.gmra.mrb[4].mxu1 %vm520_vm9, %v502_v2 }
 0x173   : > { %836 = vmatprep.mubr.msk.f32.mxu1 %vm893_vm3, %v891_v0 }
 0x174   : > { %v503_v6 = vmax.f32 %v472_v4, 0.0 }
 0x175   : > { %v476_v7 = vpop.f32.mrb[8].mxu0 }
 0x176   : > { %v477_v8 = vadd.f32 %v730_v53, %v476_v7  ;;  %v806_v9 = vpop.f32.mrb[9].mxu0  ;;  %837 = vmatmul.mubr.msk.f32.gmra.mrb[6].mxu1 %vm520_vm9, %v503_v6 }
 0x177   : > { %839 = vmatprep.mubr.msk.f32.mxu1 %vm893_vm3, %v891_v0 }
 0x178   : > { %v504_v10 = vmax.f32 %v477_v8, 0.0 }
 0x179   : > { %v481_v11 = vpop.f32.mrb[10].mxu0 }
 0x17a   : > { %v482_v12 = vadd.f32 %v730_v53, %v481_v11  ;;  %v809_v13 = vpop.f32.mrb[11].mxu0  ;;  %840 = vmatmul.mubr.msk.f32.gmra.mrb[8].mxu1 %vm520_vm9, %v504_v10 }
 0x17b   : > { %842 = vmatprep.mubr.msk.f32.mxu1 %vm893_vm3, %v891_v0 }
 0x17c   : > { %v505_v14 = vmax.f32 %v482_v12, 0.0 }
 0x17d   : > { %v486_v15 = vpop.f32.mrb[12].mxu0 }
 0x17e   : > { %v487_v16 = vadd.f32 %v730_v53, %v486_v15  ;;  %v812_v17 = vpop.f32.mrb[13].mxu0  ;;  %843 = vmatmul.mubr.msk.f32.gmra.mrb[10].mxu1 %vm520_vm9, %v505_v14 }
 0x17f   : > { %845 = vmatprep.mubr.msk.f32.mxu1 %vm893_vm3, %v891_v0 }
 0x180   : > { %v506_v18 = vmax.f32 %v487_v16, 0.0 }
 0x181   : > { %v491_v19 = vpop.f32.mrb[14].mxu0 }
 0x182   : > { %v492_v20 = vadd.f32 %v730_v53, %v491_v19  ;;  %v815_v21 = vpop.f32.mrb[15].mxu0  ;;  %846 = vmatmul.mubr.msk.f32.gmra.mrb[12].mxu1 %vm520_vm9, %v506_v18 }
 0x183   : > { %848 = vmatprep.mubr.msk.f32.mxu1 %vm893_vm3, %v891_v0 }
 0x184   : > { %v507_v22 = vmax.f32 %v492_v20, 0.0 }
 0x185   : > { %v496_v23 = vpop.f32.mrb[16].mxu0 }
 0x186   : > { %v497_v24 = vadd.f32 %v730_v53, %v496_v23  ;;  %v818_v25 = vpop.f32.mrb[17].mxu0  ;;  %849 = vmatmul.mubr.msk.f32.gmra.mrb[14].mxu1 %vm520_vm9, %v507_v22 }
 0x187   : > { %851 = vmatprep.mubr.msk.f32.mxu1 %vm893_vm3, %v891_v0 }
 0x188   : > { %v508_v26 = vmax.f32 %v497_v24, 0.0 }
 0x18a   : > { %852 = vmatmul.mubr.msk.f32.gmra.mrb[16].mxu1 %vm520_vm9, %v508_v26 }
 0x23d   : > { %v614_v28 = vpop.f32.mrb[0].mxu1 }
 0x23e   : > { %v615_v29 = vadd.f32 %v740_v27, %v614_v28  ;;  %v829_v0 = vpop.f32.mrb[1].mxu1 }
 0x240   : > { %658 = vst.msk [vmem:[%s1107_s6] sm:$0xff] %vm245_vm2, %v615_v29 }
 0x241   : > { %v619_v30 = vpop.f32.mrb[2].mxu1 }
 0x242   : > { %v620_v31 = vadd.f32 %v740_v27, %v619_v30  ;;  %v832_v32 = vpop.f32.mrb[3].mxu1 }
 0x244   : > { %659 = vst.msk [vmem:[%s1107_s6 + $0x8] sm:$0xff] %vm245_vm2, %v620_v31 }
 0x245   : > { %v624_v33 = vpop.f32.mrb[4].mxu1 }
 0x246   : > { %v625_v34 = vadd.f32 %v740_v27, %v624_v33  ;;  %v835_v35 = vpop.f32.mrb[5].mxu1 }
 0x248   : > { %660 = vst.msk [vmem:[%s1107_s6 + $0x10] sm:$0xff] %vm245_vm2, %v625_v34 }
 0x249   : > { %v629_v36 = vpop.f32.mrb[6].mxu1 }
 0x24a   : > { %v630_v37 = vadd.f32 %v740_v27, %v629_v36  ;;  %v838_v38 = vpop.f32.mrb[7].mxu1 }
 0x24c   : > { %661 = vst.msk [vmem:[%s1107_s6 + $0x18] sm:$0xff] %vm245_vm2, %v630_v37 }
 0x24d   : > { %v634_v39 = vpop.f32.mrb[8].mxu1 }
 0x24e   : > { %v635_v40 = vadd.f32 %v740_v27, %v634_v39  ;;  %v841_v41 = vpop.f32.mrb[9].mxu1 }
 0x250   : > { %662 = vst.msk [vmem:[%s1107_s6 + $0x20] sm:$0xff] %vm245_vm2, %v635_v40 }
 0x251   : > { %v639_v42 = vpop.f32.mrb[10].mxu1 }
 0x252   : > { %v640_v43 = vadd.f32 %v740_v27, %v639_v42  ;;  %v844_v44 = vpop.f32.mrb[11].mxu1 }
 0x254   : > { %663 = vst.msk [vmem:[%s1107_s6 + $0x28] sm:$0xff] %vm245_vm2, %v640_v43 }
 0x255   : > { %v644_v45 = vpop.f32.mrb[12].mxu1 }
 0x256   : > { %v645_v46 = vadd.f32 %v740_v27, %v644_v45  ;;  %v847_v47 = vpop.f32.mrb[13].mxu1 }
 0x258   : > { %664 = vst.msk [vmem:[%s1107_s6 + $0x30] sm:$0xff] %vm245_vm2, %v645_v46 }
 0x259   : > { %v649_v48 = vpop.f32.mrb[14].mxu1 }
 0x25a   : > { %v650_v49 = vadd.f32 %v740_v27, %v649_v48  ;;  %v850_v50 = vpop.f32.mrb[15].mxu1 }
 0x25c   : > { %665 = vst.msk [vmem:[%s1107_s6 + $0x38] sm:$0xff] %vm245_vm2, %v650_v49 }
 0x25d   : > { %v654_v51 = vpop.f32.mrb[16].mxu1 }
 0x25e   : > { %v655_v52 = vadd.f32 %v740_v27, %v654_v51  ;;  %v853_v53 = vpop.f32.mrb[17].mxu1 }
 0x260   : > { %667 = vst.msk [vmem:[%s1107_s6 + $0x40] sm:$0xf] %vm666_vm10, %v655_v52 }
 0x261 PF: > { %s15_s18 = sadd.s32 1, %s889_s18  }
 0x262   : > { %p12_p4 = scmp.ge.s32.totalorder %s15_s18, 4  }
 0x264   :  { %14 = sbr.rel (!%p12_p4) target bundleno = 1 (0x1), region = 70 }

</bundles_post_ra>
